<compile_context>
chip_gen: v7x
topology: tpu7x:2x2x1
jax: 0.10.0
libtpu: 0.0.40
codegen_flags: <defaults>
</compile_context>

<pallas_src>
import functools

import jax
import jax.numpy as jnp
from jax.experimental import pallas as pl
from jax.experimental.pallas import tpu as pltpu


def _round_up(n, m):
    return ((n + m - 1) // m) * m


def mlp_kernel(x_ref, w1_ref, b1_ref, w2_ref, b2_ref, w3_ref, b3_ref, o_ref,
               h1_ref, h2_ref):
    # One batch tile per grid step. Feature dims are 128-aligned, so each
    # jnp.dot is a clean bf16 MXU tile with f32 accumulation; bias add + tanh
    # run in f32 on the VPU/EUP. h1/h2 are staged through bf16 VMEM scratch so
    # big batch tiles don't spill vregs (and feed the next matmul directly).
    a1 = jnp.dot(x_ref[...], w1_ref[...], preferred_element_type=jnp.float32)
    h1_ref[...] = jnp.tanh(a1 + b1_ref[...]).astype(h1_ref.dtype)
    a2 = jnp.dot(h1_ref[...], w2_ref[...], preferred_element_type=jnp.float32)
    h2_ref[...] = jnp.tanh(a2 + b2_ref[...]).astype(h2_ref.dtype)
    a3 = jnp.dot(h2_ref[...], w3_ref[...], preferred_element_type=jnp.float32)
    o_ref[...] = (a3 + b3_ref[...]).astype(o_ref.dtype)


def prepare_params(w1, b1, w2, b2, w3, b3, *, feat_align=128):
    """Zero-pad feature dims to MXU-friendly multiples and cast weights to
    bf16. Runs ONCE at init, so the jitted forward never re-pads weights."""
    d_in, h1 = w1.shape
    h2 = w2.shape[1]
    d_out = w3.shape[1]
    d_in_p = _round_up(d_in, feat_align)
    h1_p = _round_up(h1, feat_align)
    h2_p = _round_up(h2, feat_align)
    d_out_p = _round_up(d_out, feat_align)
    # TODO(synk): on v6e/v7x with hidden >= 256 and non-256-multiple dims,
    # feat_align=256 fills the 256x256 MXU slightly better; 128 is kept as the
    # portable default (v5e MXU is 128x128).

    bf16, f32 = jnp.bfloat16, jnp.float32
    w1p = jnp.zeros((d_in_p, h1_p), bf16).at[:d_in, :h1].set(w1.astype(bf16))
    b1p = jnp.zeros((1, h1_p), f32).at[:, :h1].set(b1.reshape(1, -1).astype(f32))
    w2p = jnp.zeros((h1_p, h2_p), bf16).at[:h1, :h2].set(w2.astype(bf16))
    b2p = jnp.zeros((1, h2_p), f32).at[:, :h2].set(b2.reshape(1, -1).astype(f32))
    w3p = jnp.zeros((h2_p, d_out_p), bf16).at[:h2, :d_out].set(w3.astype(bf16))
    b3p = jnp.zeros((1, d_out_p), f32).at[:, :d_out].set(b3.reshape(1, -1).astype(f32))
    params = (w1p, b1p, w2p, b2p, w3p, b3p)
    dims = (d_in, h1, h2, d_out)
    return params, dims


def _vmem_limit_bytes(tile_b, d_in_p, h1_p, h2_p, d_out_p, weight_buffers):
    weight_bytes = 2 * (d_in_p * h1_p + h1_p * h2_p + h2_p * d_out_p)  # bf16
    bias_bytes = 4 * (h1_p + h2_p + d_out_p)                           # f32
    io_bytes = 2 * (2 * tile_b * d_in_p) + 2 * (4 * tile_b * d_out_p)  # dbl-buffered x/out
    scratch_bytes = 2 * tile_b * (h1_p + h2_p)                         # bf16 h1/h2 staging
    needed = weight_buffers * (weight_bytes + bias_bytes) + io_bytes + scratch_bytes
    # Headroom for compiler-internal scratch; clamp under v7x's 64 MiB VMEM.
    return int(min(max(needed + (8 << 20), 32 << 20), 48 << 20))


@functools.partial(
    jax.jit, static_argnames=("dims", "tile_b", "single_buffer_weights"))
def _mlp_forward_impl(x, params, *, dims, tile_b, single_buffer_weights):
    w1p, b1p, w2p, b2p, w3p, b3p = params
    B, d_in = x.shape
    d_out = dims[3]
    d_in_p, h1_p = w1p.shape
    h2_p = w2p.shape[1]
    d_out_p = w3p.shape[1]

    # Batch tiling: 16-aligned (bf16 sublane packing). Keep >= 2 grid steps
    # when B allows so v7x's two TensorCores both get work.
    b_min = _round_up(B, 16)
    tb = _round_up(min(tile_b, b_min), 16)
    if b_min >= 32:
        tb = min(tb, _round_up((b_min + 1) // 2, 16))
    b_pad = _round_up(B, tb)
    grid = (b_pad // tb,)

    # Only the activation gets padded per call (weights were padded at init).
    xp = jnp.zeros((b_pad, d_in_p), jnp.bfloat16).at[:B, :d_in].set(
        x.astype(jnp.bfloat16))

    def resident(shape):
        # Constant block index across the batch grid -> loaded into VMEM once.
        if single_buffer_weights:
            return pl.BlockSpec(shape, lambda i: (0, 0),
                                pipeline_mode=pl.Buffered(1))
        return pl.BlockSpec(shape, lambda i: (0, 0))

    n_bufs = 1 if single_buffer_weights else 2
    flops = 2 * b_pad * (d_in_p * h1_p + h1_p * h2_p + h2_p * d_out_p)
    transcendentals = b_pad * (h1_p + h2_p)
    bytes_accessed = (
        2 * b_pad * d_in_p + 4 * b_pad * d_out_p
        + 2 * (d_in_p * h1_p + h1_p * h2_p + h2_p * d_out_p)
        + 4 * (h1_p + h2_p + d_out_p))

    out_p = pl.pallas_call(
        mlp_kernel,
        out_shape=jax.ShapeDtypeStruct((b_pad, d_out_p), jnp.float32),
        grid=grid,
        in_specs=[
            pl.BlockSpec((tb, d_in_p), lambda i: (i, 0)),  # x: tiled over batch
            resident((d_in_p, h1_p)),
            resident((1, h1_p)),
            resident((h1_p, h2_p)),
            resident((1, h2_p)),
            resident((h2_p, d_out_p)),
            resident((1, d_out_p)),
        ],
        out_specs=pl.BlockSpec((tb, d_out_p), lambda i: (i, 0)),
        scratch_shapes=[
            pltpu.VMEM((tb, h1_p), jnp.bfloat16),
            pltpu.VMEM((tb, h2_p), jnp.bfloat16),
        ],
        compiler_params=pltpu.CompilerParams(
            dimension_semantics=("parallel",),  # batch tiles are independent
            vmem_limit_bytes=_vmem_limit_bytes(
                tb, d_in_p, h1_p, h2_p, d_out_p, n_bufs),
        ),
        cost_estimate=pl.CostEstimate(
            flops=flops,
            transcendentals=transcendentals,
            bytes_accessed=bytes_accessed),
    )(xp, w1p, b1p, w2p, b2p, w3p, b3p)

    return out_p[:B, :d_out]


_SINGLE_BUFFER_OK = None


def mlp_forward(x, params, dims, *, tile_b=512):
    """Forward pass with single-buffered resident weights; falls back to the
    default double-buffered specs if this build rejects pl.Buffered(1)."""
    global _SINGLE_BUFFER_OK
    if _SINGLE_BUFFER_OK is None:
        try:
            out = _mlp_forward_impl(x, params, dims=dims, tile_b=tile_b,
                                    single_buffer_weights=True)
            _SINGLE_BUFFER_OK = True
            return out
        except Exception:
            _SINGLE_BUFFER_OK = False
    return _mlp_forward_impl(x, params, dims=dims, tile_b=tile_b,
                             single_buffer_weights=_SINGLE_BUFFER_OK)


def init_linear(key, fan_in, fan_out):
    # Deterministic init mimicking PyTorch's U(-1/sqrt(fan_in), 1/sqrt(fan_in)).
    kw, kb = jax.random.split(key)
    bound = 1.0 / jnp.sqrt(fan_in)
    w = jax.random.uniform(kw, (fan_in, fan_out), jnp.float32, -bound, bound)
    b = jax.random.uniform(kb, (1, fan_out), jnp.float32, -bound, bound)
    return w, b


if __name__ == "__main__":
    input_size, hidden_size, output_size = 16, 32, 8
    batch = 4

    key = jax.random.PRNGKey(0)
    kx, k1, k2, k3 = jax.random.split(key, 4)

    x = jax.random.normal(kx, (batch, input_size), jnp.float32)
    w1, b1 = init_linear(k1, input_size, hidden_size)
    w2, b2 = init_linear(k2, hidden_size, hidden_size)
    w3, b3 = init_linear(k3, hidden_size, output_size)

    params, dims = prepare_params(w1, b1, w2, b2, w3, b3)  # once, outside jit
    out = mlp_forward(x, params, dims)
    out = jax.block_until_ready(out)

    # Pure-JAX f32 reference. Kernel uses bf16 MXU inputs, so tolerance is
    # loosened accordingly (bias/tanh stay f32 inside the kernel).
    ref = jnp.tanh(x @ w1 + b1)
    ref = jnp.tanh(ref @ w2 + b2)
    ref = ref @ w3 + b3
    assert out.shape == (batch, output_size)
    assert jnp.allclose(out, ref, atol=3e-2, rtol=3e-2), "mismatch vs reference"

    print("KERNEL_OK")
</pallas_src>

<mosaic_0001>
module attributes {stable_mosaic.version = 11 : i64} {
  func.func @mlp_kernel(%arg0: i32, %arg1: memref<16x128xbf16, #tpu.memory_space<vmem>>, %arg2: memref<128x128xbf16, #tpu.memory_space<vmem>>, %arg3: memref<1x128xf32, #tpu.memory_space<vmem>>, %arg4: memref<128x128xbf16, #tpu.memory_space<vmem>>, %arg5: memref<1x128xf32, #tpu.memory_space<vmem>>, %arg6: memref<128x128xbf16, #tpu.memory_space<vmem>>, %arg7: memref<1x128xf32, #tpu.memory_space<vmem>>, %arg8: memref<16x128xf32, #tpu.memory_space<vmem>>, %arg9: memref<16x128xbf16, #tpu.memory_space<vmem>>, %arg10: memref<16x128xbf16, #tpu.memory_space<vmem>>) attributes {dimension_semantics = [#tpu.dimension_semantics<parallel>], iteration_bounds = array<i64: 1>, scalar_prefetch = 0 : i64, scratch_operands = 2 : i64, tpu.core_type = #tpu.core_type<tc>, window_params = [{transform_indices = @transform_0, window_bounds = array<i64: 16, 128>}, {pipeline_mode = #tpu.pipeline_mode<synchronous>, transform_indices = @transform_1, window_bounds = array<i64: 128, 128>}, {pipeline_mode = #tpu.pipeline_mode<synchronous>, transform_indices = @transform_2, window_bounds = array<i64: 1, 128>}, {pipeline_mode = #tpu.pipeline_mode<synchronous>, transform_indices = @transform_3, window_bounds = array<i64: 128, 128>}, {pipeline_mode = #tpu.pipeline_mode<synchronous>, transform_indices = @transform_4, window_bounds = array<i64: 1, 128>}, {pipeline_mode = #tpu.pipeline_mode<synchronous>, transform_indices = @transform_5, window_bounds = array<i64: 128, 128>}, {pipeline_mode = #tpu.pipeline_mode<synchronous>, transform_indices = @transform_6, window_bounds = array<i64: 1, 128>}, {transform_indices = @transform_7, window_bounds = array<i64: 16, 128>}]} {
    %c0 = arith.constant 0 : index
    %c0_0 = arith.constant 0 : index
    %0 = vector.load %arg1[%c0, %c0_0] : memref<16x128xbf16, #tpu.memory_space<vmem>>, vector<16x128xbf16>
    %c0_1 = arith.constant 0 : index
    %c0_2 = arith.constant 0 : index
    %1 = vector.load %arg2[%c0_1, %c0_2] : memref<128x128xbf16, #tpu.memory_space<vmem>>, vector<128x128xbf16>
    %cst = arith.constant dense<0.000000e+00> : vector<16x128xf32>
    %2 = tpu.matmul %0, %1, %cst {dimension_numbers = #tpu.dot_dimension_numbers<[1], [0], [0], [1], [0, 0, 1, 1], [], []>} : vector<16x128xbf16>, vector<128x128xbf16>, vector<16x128xf32> -> vector<16x128xf32>
    %c0_3 = arith.constant 0 : index
    %c0_4 = arith.constant 0 : index
    %3 = vector.load %arg3[%c0_3, %c0_4] : memref<1x128xf32, #tpu.memory_space<vmem>>, vector<1x128xf32>
    %4 = vector.broadcast %3 : vector<1x128xf32> to vector<16x128xf32>
    %5 = arith.addf %2, %4 : vector<16x128xf32>
    %6 = math.tanh %5 : vector<16x128xf32>
    %7 = arith.truncf %6 : vector<16x128xf32> to vector<16x128xbf16>
    %c0_5 = arith.constant 0 : index
    %c0_6 = arith.constant 0 : index
    %8 = vector.load %arg9[%c0_5, %c0_6] : memref<16x128xbf16, #tpu.memory_space<vmem>>, vector<16x128xbf16>
    tpu.vector_store %arg9[%c0_5, %c0_6], %7 {strides = array<i32>} : memref<16x128xbf16, #tpu.memory_space<vmem>>, vector<16x128xbf16>,
    %c0_7 = arith.constant 0 : index
    %c0_8 = arith.constant 0 : index
    %9 = vector.load %arg9[%c0_7, %c0_8] : memref<16x128xbf16, #tpu.memory_space<vmem>>, vector<16x128xbf16>
    %c0_9 = arith.constant 0 : index
    %c0_10 = arith.constant 0 : index
    %10 = vector.load %arg4[%c0_9, %c0_10] : memref<128x128xbf16, #tpu.memory_space<vmem>>, vector<128x128xbf16>
    %cst_11 = arith.constant dense<0.000000e+00> : vector<16x128xf32>
    %11 = tpu.matmul %9, %10, %cst_11 {dimension_numbers = #tpu.dot_dimension_numbers<[1], [0], [0], [1], [0, 0, 1, 1], [], []>} : vector<16x128xbf16>, vector<128x128xbf16>, vector<16x128xf32> -> vector<16x128xf32>
    %c0_12 = arith.constant 0 : index
    %c0_13 = arith.constant 0 : index
    %12 = vector.load %arg5[%c0_12, %c0_13] : memref<1x128xf32, #tpu.memory_space<vmem>>, vector<1x128xf32>
    %13 = vector.broadcast %12 : vector<1x128xf32> to vector<16x128xf32>
    %14 = arith.addf %11, %13 : vector<16x128xf32>
    %15 = math.tanh %14 : vector<16x128xf32>
    %16 = arith.truncf %15 : vector<16x128xf32> to vector<16x128xbf16>
    %c0_14 = arith.constant 0 : index
    %c0_15 = arith.constant 0 : index
    %17 = vector.load %arg10[%c0_14, %c0_15] : memref<16x128xbf16, #tpu.memory_space<vmem>>, vector<16x128xbf16>
    tpu.vector_store %arg10[%c0_14, %c0_15], %16 {strides = array<i32>} : memref<16x128xbf16, #tpu.memory_space<vmem>>, vector<16x128xbf16>,
    %c0_16 = arith.constant 0 : index
    %c0_17 = arith.constant 0 : index
    %18 = vector.load %arg10[%c0_16, %c0_17] : memref<16x128xbf16, #tpu.memory_space<vmem>>, vector<16x128xbf16>
    %c0_18 = arith.constant 0 : index
    %c0_19 = arith.constant 0 : index
    %19 = vector.load %arg6[%c0_18, %c0_19] : memref<128x128xbf16, #tpu.memory_space<vmem>>, vector<128x128xbf16>
    %cst_20 = arith.constant dense<0.000000e+00> : vector<16x128xf32>
    %20 = tpu.matmul %18, %19, %cst_20 {dimension_numbers = #tpu.dot_dimension_numbers<[1], [0], [0], [1], [0, 0, 1, 1], [], []>} : vector<16x128xbf16>, vector<128x128xbf16>, vector<16x128xf32> -> vector<16x128xf32>
    %c0_21 = arith.constant 0 : index
    %c0_22 = arith.constant 0 : index
    %21 = vector.load %arg7[%c0_21, %c0_22] : memref<1x128xf32, #tpu.memory_space<vmem>>, vector<1x128xf32>
    %22 = vector.broadcast %21 : vector<1x128xf32> to vector<16x128xf32>
    %23 = arith.addf %20, %22 : vector<16x128xf32>
    %c0_23 = arith.constant 0 : index
    %c0_24 = arith.constant 0 : index
    %24 = vector.load %arg8[%c0_23, %c0_24] : memref<16x128xf32, #tpu.memory_space<vmem>>, vector<16x128xf32>
    tpu.vector_store %arg8[%c0_23, %c0_24], %23 {strides = array<i32>} : memref<16x128xf32, #tpu.memory_space<vmem>>, vector<16x128xf32>,
    return
  }
  func.func @transform_0(%arg0: i32) -> (i32, i32) {
    %c0_i32 = arith.constant 0 : i32
    %c0_i32_0 = arith.constant 0 : i32
    return %arg0, %c0_i32 : i32, i32
  }
  func.func @transform_1(%arg0: i32) -> (i32, i32) {
    %c0_i32 = arith.constant 0 : i32
    %c0_i32_0 = arith.constant 0 : i32
    %c0_i32_1 = arith.constant 0 : i32
    return %c0_i32, %c0_i32_0 : i32, i32
  }
  func.func @transform_2(%arg0: i32) -> (i32, i32) {
    %c0_i32 = arith.constant 0 : i32
    %c0_i32_0 = arith.constant 0 : i32
    %c0_i32_1 = arith.constant 0 : i32
    return %c0_i32, %c0_i32_0 : i32, i32
  }
  func.func @transform_3(%arg0: i32) -> (i32, i32) {
    %c0_i32 = arith.constant 0 : i32
    %c0_i32_0 = arith.constant 0 : i32
    %c0_i32_1 = arith.constant 0 : i32
    return %c0_i32, %c0_i32_0 : i32, i32
  }
  func.func @transform_4(%arg0: i32) -> (i32, i32) {
    %c0_i32 = arith.constant 0 : i32
    %c0_i32_0 = arith.constant 0 : i32
    %c0_i32_1 = arith.constant 0 : i32
    return %c0_i32, %c0_i32_0 : i32, i32
  }
  func.func @transform_5(%arg0: i32) -> (i32, i32) {
    %c0_i32 = arith.constant 0 : i32
    %c0_i32_0 = arith.constant 0 : i32
    %c0_i32_1 = arith.constant 0 : i32
    return %c0_i32, %c0_i32_0 : i32, i32
  }
  func.func @transform_6(%arg0: i32) -> (i32, i32) {
    %c0_i32 = arith.constant 0 : i32
    %c0_i32_0 = arith.constant 0 : i32
    %c0_i32_1 = arith.constant 0 : i32
    return %c0_i32, %c0_i32_0 : i32, i32
  }
  func.func @transform_7(%arg0: i32) -> (i32, i32) {
    %c0_i32 = arith.constant 0 : i32
    %c0_i32_0 = arith.constant 0 : i32
    return %arg0, %c0_i32 : i32, i32
  }
}

module attributes {stable_mosaic.version = 11 : i64} {
  func.func @mlp_kernel(%arg0: i32, %arg1: memref<16x128xbf16, #tpu.memory_space<vmem>>, %arg2: memref<128x128xbf16, #tpu.memory_space<vmem>>, %arg3: memref<1x128xf32, #tpu.memory_space<vmem>>, %arg4: memref<128x128xbf16, #tpu.memory_space<vmem>>, %arg5: memref<1x128xf32, #tpu.memory_space<vmem>>, %arg6: memref<128x128xbf16, #tpu.memory_space<vmem>>, %arg7: memref<1x128xf32, #tpu.memory_space<vmem>>, %arg8: memref<16x128xf32, #tpu.memory_space<vmem>>, %arg9: memref<16x128xbf16, #tpu.memory_space<vmem>>, %arg10: memref<16x128xbf16, #tpu.memory_space<vmem>>) attributes {dimension_semantics = [#tpu.dimension_semantics<parallel>], iteration_bounds = array<i64: 1>, scalar_prefetch = 0 : i64, scratch_operands = 2 : i64, tpu.core_type = #tpu.core_type<tc>, window_params = [{transform_indices = @transform_0, window_bounds = array<i64: 16, 128>}, {pipeline_mode = #tpu.pipeline_mode<synchronous>, transform_indices = @transform_1, window_bounds = array<i64: 128, 128>}, {pipeline_mode = #tpu.pipeline_mode<synchronous>, transform_indices = @transform_2, window_bounds = array<i64: 1, 128>}, {pipeline_mode = #tpu.pipeline_mode<synchronous>, transform_indices = @transform_3, window_bounds = array<i64: 128, 128>}, {pipeline_mode = #tpu.pipeline_mode<synchronous>, transform_indices = @transform_4, window_bounds = array<i64: 1, 128>}, {pipeline_mode = #tpu.pipeline_mode<synchronous>, transform_indices = @transform_5, window_bounds = array<i64: 128, 128>}, {pipeline_mode = #tpu.pipeline_mode<synchronous>, transform_indices = @transform_6, window_bounds = array<i64: 1, 128>}, {transform_indices = @transform_7, window_bounds = array<i64: 16, 128>}]} {
    %c0 = arith.constant 0 : index
    %c0_0 = arith.constant 0 : index
    %0 = vector.load %arg1[%c0, %c0_0] : memref<16x128xbf16, #tpu.memory_space<vmem>>, vector<16x128xbf16>
    %c0_1 = arith.constant 0 : index
    %c0_2 = arith.constant 0 : index
    %1 = vector.load %arg2[%c0_1, %c0_2] : memref<128x128xbf16, #tpu.memory_space<vmem>>, vector<128x128xbf16>
    %cst = arith.constant dense<0.000000e+00> : vector<16x128xf32>
    %2 = tpu.matmul %0, %1, %cst {dimension_numbers = #tpu.dot_dimension_numbers<[1], [0], [0], [1], [0, 0, 1, 1], [], []>} : vector<16x128xbf16>, vector<128x128xbf16>, vector<16x128xf32> -> vector<16x128xf32>
    %c0_3 = arith.constant 0 : index
    %c0_4 = arith.constant 0 : index
    %3 = vector.load %arg3[%c0_3, %c0_4] : memref<1x128xf32, #tpu.memory_space<vmem>>, vector<1x128xf32>
    %4 = vector.broadcast %3 : vector<1x128xf32> to vector<16x128xf32>
    %5 = arith.addf %2, %4 : vector<16x128xf32>
    %6 = math.tanh %5 : vector<16x128xf32>
    %7 = arith.truncf %6 : vector<16x128xf32> to vector<16x128xbf16>
    %c0_5 = arith.constant 0 : index
    %c0_6 = arith.constant 0 : index
    %8 = vector.load %arg9[%c0_5, %c0_6] : memref<16x128xbf16, #tpu.memory_space<vmem>>, vector<16x128xbf16>
    tpu.vector_store %arg9[%c0_5, %c0_6], %7 {strides = array<i32>} : memref<16x128xbf16, #tpu.memory_space<vmem>>, vector<16x128xbf16>,
    %c0_7 = arith.constant 0 : index
    %c0_8 = arith.constant 0 : index
    %9 = vector.load %arg9[%c0_7, %c0_8] : memref<16x128xbf16, #tpu.memory_space<vmem>>, vector<16x128xbf16>
    %c0_9 = arith.constant 0 : index
    %c0_10 = arith.constant 0 : index
    %10 = vector.load %arg4[%c0_9, %c0_10] : memref<128x128xbf16, #tpu.memory_space<vmem>>, vector<128x128xbf16>
    %cst_11 = arith.constant dense<0.000000e+00> : vector<16x128xf32>
    %11 = tpu.matmul %9, %10, %cst_11 {dimension_numbers = #tpu.dot_dimension_numbers<[1], [0], [0], [1], [0, 0, 1, 1], [], []>} : vector<16x128xbf16>, vector<128x128xbf16>, vector<16x128xf32> -> vector<16x128xf32>
    %c0_12 = arith.constant 0 : index
    %c0_13 = arith.constant 0 : index
    %12 = vector.load %arg5[%c0_12, %c0_13] : memref<1x128xf32, #tpu.memory_space<vmem>>, vector<1x128xf32>
    %13 = vector.broadcast %12 : vector<1x128xf32> to vector<16x128xf32>
    %14 = arith.addf %11, %13 : vector<16x128xf32>
    %15 = math.tanh %14 : vector<16x128xf32>
    %16 = arith.truncf %15 : vector<16x128xf32> to vector<16x128xbf16>
    %c0_14 = arith.constant 0 : index
    %c0_15 = arith.constant 0 : index
    %17 = vector.load %arg10[%c0_14, %c0_15] : memref<16x128xbf16, #tpu.memory_space<vmem>>, vector<16x128xbf16>
    tpu.vector_store %arg10[%c0_14, %c0_15], %16 {strides = array<i32>} : memref<16x128xbf16, #tpu.memory_space<vmem>>, vector<16x128xbf16>,
    %c0_16 = arith.constant 0 : index
    %c0_17 = arith.constant 0 : index
    %18 = vector.load %arg10[%c0_16, %c0_17] : memref<16x128xbf16, #tpu.memory_space<vmem>>, vector<16x128xbf16>
    %c0_18 = arith.constant 0 : index
    %c0_19 = arith.constant 0 : index
    %19 = vector.load %arg6[%c0_18, %c0_19] : memref<128x128xbf16, #tpu.memory_space<vmem>>, vector<128x128xbf16>
    %cst_20 = arith.constant dense<0.000000e+00> : vector<16x128xf32>
    %20 = tpu.matmul %18, %19, %cst_20 {dimension_numbers = #tpu.dot_dimension_numbers<[1], [0], [0], [1], [0, 0, 1, 1], [], []>} : vector<16x128xbf16>, vector<128x128xbf16>, vector<16x128xf32> -> vector<16x128xf32>
    %c0_21 = arith.constant 0 : index
    %c0_22 = arith.constant 0 : index
    %21 = vector.load %arg7[%c0_21, %c0_22] : memref<1x128xf32, #tpu.memory_space<vmem>>, vector<1x128xf32>
    %22 = vector.broadcast %21 : vector<1x128xf32> to vector<16x128xf32>
    %23 = arith.addf %20, %22 : vector<16x128xf32>
    %c0_23 = arith.constant 0 : index
    %c0_24 = arith.constant 0 : index
    %24 = vector.load %arg8[%c0_23, %c0_24] : memref<16x128xf32, #tpu.memory_space<vmem>>, vector<16x128xf32>
    tpu.vector_store %arg8[%c0_23, %c0_24], %23 {strides = array<i32>} : memref<16x128xf32, #tpu.memory_space<vmem>>, vector<16x128xf32>,
    return
  }
  func.func @transform_0(%arg0: i32) -> (i32, i32) {
    %c0_i32 = arith.constant 0 : i32
    %c0_i32_0 = arith.constant 0 : i32
    return %arg0, %c0_i32 : i32, i32
  }
  func.func @transform_1(%arg0: i32) -> (i32, i32) {
    %c0_i32 = arith.constant 0 : i32
    %c0_i32_0 = arith.constant 0 : i32
    %c0_i32_1 = arith.constant 0 : i32
    return %c0_i32, %c0_i32_0 : i32, i32
  }
  func.func @transform_2(%arg0: i32) -> (i32, i32) {
    %c0_i32 = arith.constant 0 : i32
    %c0_i32_0 = arith.constant 0 : i32
    %c0_i32_1 = arith.constant 0 : i32
    return %c0_i32, %c0_i32_0 : i32, i32
  }
  func.func @transform_3(%arg0: i32) -> (i32, i32) {
    %c0_i32 = arith.constant 0 : i32
    %c0_i32_0 = arith.constant 0 : i32
    %c0_i32_1 = arith.constant 0 : i32
    return %c0_i32, %c0_i32_0 : i32, i32
  }
  func.func @transform_4(%arg0: i32) -> (i32, i32) {
    %c0_i32 = arith.constant 0 : i32
    %c0_i32_0 = arith.constant 0 : i32
    %c0_i32_1 = arith.constant 0 : i32
    return %c0_i32, %c0_i32_0 : i32, i32
  }
  func.func @transform_5(%arg0: i32) -> (i32, i32) {
    %c0_i32 = arith.constant 0 : i32
    %c0_i32_0 = arith.constant 0 : i32
    %c0_i32_1 = arith.constant 0 : i32
    return %c0_i32, %c0_i32_0 : i32, i32
  }
  func.func @transform_6(%arg0: i32) -> (i32, i32) {
    %c0_i32 = arith.constant 0 : i32
    %c0_i32_0 = arith.constant 0 : i32
    %c0_i32_1 = arith.constant 0 : i32
    return %c0_i32, %c0_i32_0 : i32, i32
  }
  func.func @transform_7(%arg0: i32) -> (i32, i32) {
    %c0_i32 = arith.constant 0 : i32
    %c0_i32_0 = arith.constant 0 : i32
    return %arg0, %c0_i32 : i32, i32
  }
}

</mosaic_0001>

<bundles_post_ra>
// kernel: _mlp_forward_impl.1
= control target key start
LH: loop header
LB: loop body
LE: loop exit
PB: predicated region body
PF: predicated region fallthrough
CT: control target
= control target key end

     0   :  { %12 = vsyncpa [#allocation5], 0  ;;  %s802_s0 = inlined_call_operand.vmem [shape: bf16[16,128], index: 0, kind: input, shape index: {}]   ;;  %s803_s1 = inlined_call_operand.hbm [shape: bf16[128,128], index: 1, kind: input, shape index: {}]   ;;  %s804_s2 = inlined_call_operand.vmem [shape: f32[1,128], index: 2, kind: input, shape index: {}]   ;;  %s805_s3 = inlined_call_operand.hbm [shape: bf16[128,128], index: 3, kind: input, shape index: {}]   ;;  %s806_s4 = inlined_call_operand.vmem [shape: f32[1,128], index: 4, kind: input, shape index: {}]   ;;  %s807_s5 = inlined_call_operand.hbm [shape: bf16[128,128], index: 5, kind: input, shape index: {}]   ;;  %s808_s6 = inlined_call_operand.vmem [shape: f32[1,128], index: 6, kind: input, shape index: {}]   ;;  %s809_s7 = inlined_call_operand.vmem [shape: f32[16,128], index: 7, kind: output, shape index: {}]  }
   0x1   :  { %13 = vsyncpa [#allocation7], 0  ;;  %s655_s24 = smov [#allocation6]   ;;  %s656_s26 = smov [#allocation4]  }
   0x2   :  { %s35_s25 = sshll.u32 %s655_s24, 4  ;;  %s21_s27 = sshll.u32 %s656_s26, 4  ;;  %s36_s25 = int_to_ptr.vmem [resolvable:$true] %s35_s25  ;;  %s702_s27 = int_to_ptr.vmem [resolvable:$true] %s21_s27 }
   0x3   :  { %s585_s30 = scalar_lea.hbm %s805_s3, 1024 }
   0x4   :  { %p586_p0 = scmp.ne.s32.totalorder %s805_s3, %s585_s30  ;;  %p589_p1 = scmp.lt.u32.totalorder %s585_s30, %s805_s3 }
   0x6   :  { %p591_p2 = pnand %p589_p1, %p586_p0 }
   0x8   :  { %594 = shalt.err (!%p591_p2)
}
   0x9   :  { %s595_s12 = scalar_lea.vmem %s36_s25, 1024  ;;  %p600_p4 = scmp.lt.s32.totalorder %s36_s25, %s36_s25 }
   0xa   :  { %p596_p3 = scmp.ne.s32.totalorder %s36_s25, %s595_s12  ;;  %p601_p5 = scmp.lt.s32.totalorder %s595_s12, %s595_s12 }
   0xc   :  { %p602_p6 = por %p601_p5, %p600_p4 }
   0xe   :  { %p603_p7 = pnand %p602_p6, %p596_p3 }
  0x10   :  { %606 = shalt.err (!%p603_p7)
}
  0x11   :  { %s657_s13 = smov 64   ;;  %s658_s14 = smov 4  }
  0x12   :  { %41 = dma.hbm_to_vmem [thread:$0]  %s805_s3, 1024, %s36_s25, [#allocation7], %s657_s13, %s657_s13, %s658_s14  }
  0x13   :  { %s607_s19 = scalar_lea.hbm %s803_s1, 1024 }
  0x14   :  { %p608_p8 = scmp.ne.s32.totalorder %s803_s1, %s607_s19  ;;  %p611_p9 = scmp.lt.u32.totalorder %s607_s19, %s803_s1 }
  0x16   :  { %p613_p10 = pnand %p611_p9, %p608_p8 }
  0x18   :  { %616 = shalt.err (!%p613_p10)
}
  0x19   :  { %s617_s24 = scalar_lea.vmem %s702_s27, 1024  ;;  %p622_p12 = scmp.lt.s32.totalorder %s702_s27, %s702_s27 }
  0x1a   :  { %p618_p11 = scmp.ne.s32.totalorder %s702_s27, %s617_s24  ;;  %p623_p13 = scmp.lt.s32.totalorder %s617_s24, %s617_s24 }
  0x1c   :  { %p624_p0 = por %p623_p13, %p622_p12 }
  0x1e   :  { %p625_p1 = pnand %p624_p0, %p618_p11 }
  0x20   :  { %628 = shalt.err (!%p625_p1)
}
  0x21   :  { %27 = dma.hbm_to_vmem [thread:$0]  %s803_s1, 1024, %s702_s27, [#allocation5], %s657_s13, %s657_s13, %s658_s14  }
  0x22   :  { %s659_s26 = smov [#allocation8]   ;;  %s629_s8 = scalar_lea.hbm %s807_s5, 1024 }
  0x23   :  { %s49_s28 = sshll.u32 %s659_s26, 4  ;;  %p630_p2 = scmp.ne.s32.totalorder %s807_s5, %s629_s8  ;;  %s50_s28 = int_to_ptr.vmem [resolvable:$true] %s49_s28 }
  0x24   :  { %p633_p3 = scmp.lt.u32.totalorder %s629_s8, %s807_s5 }
  0x26   :  { %p635_p4 = pnand %p633_p3, %p630_p2 }
  0x28   :  { %638 = shalt.err (!%p635_p4)
}
  0x29   :  { %s639_s15 = scalar_lea.vmem %s50_s28, 1024  ;;  %p644_p6 = scmp.lt.s32.totalorder %s50_s28, %s50_s28 }
  0x2a   :  { %p640_p5 = scmp.ne.s32.totalorder %s50_s28, %s639_s15  ;;  %p645_p7 = scmp.lt.s32.totalorder %s639_s15, %s639_s15 }
  0x2c   :  { %p646_p8 = por %p645_p7, %p644_p6 }
  0x2e   :  { %p647_p9 = pnand %p646_p8, %p640_p5 }
  0x30   :  { %650 = shalt.err (!%p647_p9)
}
  0x31   :  { %55 = dma.hbm_to_vmem [thread:$0]  %s807_s5, 1024, %s50_s28, [#allocation7], %s657_s13, %s657_s13, %s658_s14  }
  0x32   :  { %651 = dma.done.wait [#allocation5], 1024  }
  0x33   :  { %652 = vsyncadd [#allocation5], 4294966272 }
  0x34   :  { %653 = dma.done.wait [#allocation7], 2048  }
  0x35   :  { %654 = vsyncadd [#allocation7], 4294965248  ;;  %v660_v0 = vmov 0.0   ;;  %vm661_vm0 = vmmov 0   ;;  %v552_v1 = vld [vmem:[#allocation4] sm:$0xff]   ;;  %v553_v2 = vld [vmem:[#allocation4 + $0x8] sm:$0xff]  }
  0x36   :  { %485 = vmatprep.subr.bf16.mxu0 %v660_v0  ;;  %501 = vmatprep.mubr.msk.bf16.mxu0 %vm661_vm0, %v660_v0  ;;  %v554_v3 = vld [vmem:[#allocation4 + $0x10] sm:$0xff]   ;;  %v561_v4 = vld [vmem:[#allocation6] sm:$0xff]   ;;  %v555_v5 = vld [vmem:[#allocation4 + $0x18] sm:$0xff]  }
  0x37   :  { %505 = vmatprep.subr.bf16.mxu1 %v660_v0  ;;  %521 = vmatprep.mubr.msk.bf16.mxu1 %vm661_vm0, %v660_v0  ;;  %v562_v6 = vld [vmem:[#allocation6 + $0x8] sm:$0xff]   ;;  %v556_v7 = vld [vmem:[#allocation4 + $0x20] sm:$0xff]   ;;  %v563_v8 = vld [vmem:[#allocation6 + $0x10] sm:$0xff]  }
  0x38   :  { %486 = vmatpush3.bf16.msra.mxu0 %v552_v1  ;;  %506 = vmatpush3.bf16.msra.mxu1 %v561_v4  ;;  %v557_v9 = vld [vmem:[#allocation4 + $0x28] sm:$0xff]   ;;  %v564_v10 = vld [vmem:[#allocation6 + $0x18] sm:$0xff]   ;;  %v558_v11 = vld [vmem:[#allocation4 + $0x30] sm:$0xff]  }
  0x39   :  { %487 = vmatprep.subr.bf16.mxu0 %v660_v0  ;;  %507 = vmatprep.subr.bf16.mxu1 %v660_v0  ;;  %v559_v12 = vld [vmem:[#allocation4 + $0x38] sm:$0xff]   ;;  %v560_v13 = vld [vmem:[%s802_s0] sm:$0xff]   ;;  %v566_v15 = vld [vmem:[#allocation6 + $0x28] sm:$0xff]  }
  0x3a   :  { %v565_v14 = vld [vmem:[#allocation6 + $0x20] sm:$0xff]   ;;  %v567_v16 = vld [vmem:[#allocation6 + $0x30] sm:$0xff]   ;;  %v568_v17 = vld [vmem:[#allocation6 + $0x38] sm:$0xff]  }
  0x3b   :  { %v569_v18 = vld [vmem:[#allocation8] sm:$0xff]   ;;  %v570_v19 = vld [vmem:[#allocation8 + $0x8] sm:$0xff]   ;;  %v571_v20 = vld [vmem:[#allocation8 + $0x10] sm:$0xff]  }
  0x3c   :  { %488 = vmatpush3.bf16.msra.mxu0 %v553_v2  ;;  %508 = vmatpush3.bf16.msra.mxu1 %v562_v6  ;;  %v572_v21 = vld [vmem:[#allocation8 + $0x18] sm:$0xff]   ;;  %v430_v22 = vld [vmem:[%s804_s2] ss:$0 sm:$0xff]  ;;  %v574_v33 = vld [vmem:[#allocation8 + $0x28] sm:$0xff]  }
  0x3d   :  { %489 = vmatprep.subr.bf16.mxu0 %v660_v0  ;;  %509 = vmatprep.subr.bf16.mxu1 %v660_v0  ;;  %v573_v32 = vld [vmem:[#allocation8 + $0x20] sm:$0xff]   ;;  %v575_v34 = vld [vmem:[#allocation8 + $0x30] sm:$0xff]   ;;  %v576_v35 = vld [vmem:[#allocation8 + $0x38] sm:$0xff]  }
  0x3e   :  { %v440_v36 = vld [vmem:[%s806_s4] ss:$0 sm:$0xff] }
  0x3f   :  { %v449_v46 = vld [vmem:[%s808_s6] ss:$0 sm:$0xff] }
  0x40   :  { %490 = vmatpush3.bf16.msra.mxu0 %v554_v3  ;;  %510 = vmatpush3.bf16.msra.mxu1 %v563_v8 }
  0x41   :  { %491 = vmatprep.subr.bf16.mxu0 %v660_v0  ;;  %511 = vmatprep.subr.bf16.mxu1 %v660_v0 }
  0x44   :  { %492 = vmatpush3.bf16.msra.mxu0 %v555_v5  ;;  %512 = vmatpush3.bf16.msra.mxu1 %v564_v10 }
  0x45   :  { %493 = vmatprep.subr.bf16.mxu0 %v660_v0  ;;  %513 = vmatprep.subr.bf16.mxu1 %v660_v0 }
  0x48   :  { %494 = vmatpush3.bf16.msra.mxu0 %v556_v7  ;;  %514 = vmatpush3.bf16.msra.mxu1 %v565_v14 }
  0x49   :  { %495 = vmatprep.subr.bf16.mxu0 %v660_v0  ;;  %515 = vmatprep.subr.bf16.mxu1 %v660_v0 }
  0x4c   :  { %496 = vmatpush3.bf16.msra.mxu0 %v557_v9  ;;  %516 = vmatpush3.bf16.msra.mxu1 %v566_v15 }
  0x4d   :  { %497 = vmatprep.subr.bf16.mxu0 %v660_v0  ;;  %517 = vmatprep.subr.bf16.mxu1 %v660_v0 }
  0x50   :  { %498 = vmatpush3.bf16.msra.mxu0 %v558_v11  ;;  %518 = vmatpush3.bf16.msra.mxu1 %v567_v16 }
  0x51   :  { %499 = vmatprep.subr.bf16.mxu0 %v660_v0  ;;  %519 = vmatprep.subr.bf16.mxu1 %v660_v0 }
  0x54   :  { %500 = vmatpush3.bf16.msra.mxu0 %v559_v12  ;;  %520 = vmatpush3.bf16.msra.mxu1 %v568_v17 }
  0x55   :  { %525 = vmatprep.subr.bf16.mxu0 %v660_v0 }
  0x57   :  { %502 = vmatmul.mubr.bf16.vlgmr.msra.gmra.mrb[0].mxu0 %v560_v13 }
  0x58   :  { %541 = vmatprep.mubr.msk.bf16.mxu0 %vm661_vm0, %v660_v0  ;;  %526 = vmatpush3.bf16.msra.mxu0 %v569_v18 }
  0x59   :  { %527 = vmatprep.subr.bf16.mxu0 %v660_v0 }
  0x5c   :  { %528 = vmatpush3.bf16.msra.mxu0 %v570_v19 }
  0x5d   :  { %529 = vmatprep.subr.bf16.mxu0 %v660_v0 }
  0x60   :  { %530 = vmatpush3.bf16.msra.mxu0 %v571_v20 }
  0x61   :  { %531 = vmatprep.subr.bf16.mxu0 %v660_v0 }
  0x64   :  { %532 = vmatpush3.bf16.msra.mxu0 %v572_v21 }
  0x65   :  { %533 = vmatprep.subr.bf16.mxu0 %v660_v0 }
  0x68   :  { %534 = vmatpush3.bf16.msra.mxu0 %v573_v32 }
  0x69   :  { %535 = vmatprep.subr.bf16.mxu0 %v660_v0 }
  0x6c   :  { %536 = vmatpush3.bf16.msra.mxu0 %v574_v33 }
  0x6d   :  { %537 = vmatprep.subr.bf16.mxu0 %v660_v0 }
  0x70   :  { %538 = vmatpush3.bf16.msra.mxu0 %v575_v34 }
  0x71   :  { %539 = vmatprep.subr.bf16.mxu0 %v660_v0 }
  0x74   :  { %540 = vmatpush3.bf16.msra.mxu0 %v576_v35 }
 0x12a   :  { %v181_v23 = vpop.f32.mrb[0].mxu0 }
 0x12b   :  { %v182_v24 = vadd.f32 %v430_v22, %v181_v23  ;;  %v503_v25 = vpop.f32.mrb[1].mxu0 }
 0x12c   :  { %v184_v26 = vpop.f32.mrb[2].mxu0 }
 0x12d   :  { %v185_v27 = vadd.f32 %v430_v22, %v184_v26  ;;  %v504_v28 = vpop.f32.mrb[3].mxu0  ;;  %577 = vtanh.f32 %v182_v24 }
 0x12f   :  { %579 = vtanh.f32 %v185_v27 }
 0x137   :  { %v578_v29 = vpop.eup %577 }
 0x139   :  { %v580_v30 = vpop.eup %579 }
 0x13a   :  { %v190_v31 = vpack.c.bf16 %v580_v30, %v578_v29 }
 0x13c   :  { %522 = vmatmul.mubr.bf16.vlgmr.msra.gmra.mrb[0].mxu1 %v190_v31 }
 0x20f   :  { %v298_v37 = vpop.f32.mrb[0].mxu1 }
 0x210   :  { %v299_v38 = vadd.f32 %v440_v36, %v298_v37  ;;  %v523_v39 = vpop.f32.mrb[1].mxu1 }
 0x211   :  { %v301_v40 = vpop.f32.mrb[2].mxu1 }
 0x212   :  { %v302_v41 = vadd.f32 %v440_v36, %v301_v40  ;;  %v524_v42 = vpop.f32.mrb[3].mxu1  ;;  %581 = vtanh.f32 %v299_v38 }
 0x214   :  { %583 = vtanh.f32 %v302_v41 }
 0x21c   :  { %v582_v43 = vpop.eup %581 }
 0x21e   :  { %v584_v44 = vpop.eup %583 }
 0x21f   :  { %v307_v45 = vpack.c.bf16 %v584_v44, %v582_v43 }
 0x221   :  { %542 = vmatmul.mubr.bf16.vlgmr.msra.gmra.mrb[4].mxu0 %v307_v45 }
 0x2f4   :  { %v415_v47 = vpop.f32.mrb[4].mxu0 }
 0x2f5   :  { %v416_v48 = vadd.f32 %v449_v46, %v415_v47  ;;  %v543_v49 = vpop.f32.mrb[5].mxu0 }
 0x2f6   :  { %v418_v50 = vpop.f32.mrb[6].mxu0 }
 0x2f7   :  { %422 = vst [vmem:[%s809_s7] sm:$0xff] %v416_v48  ;;  %v419_v51 = vadd.f32 %v449_v46, %v418_v50  ;;  %v544_v52 = vpop.f32.mrb[7].mxu0 }
 0x2f9   :  { %423 = vst [vmem:[%s809_s7 + $0x8] sm:$0xff] %v419_v51 }
 0x2fa   :  { %428 = vsyncpa [#allocation5], 1 }
 0x2fb   :  { %429 = vsyncpa [#allocation7], 1 }

// kernel: _mlp_forward_impl.1
= control target key start
LH: loop header
LB: loop body
LE: loop exit
PB: predicated region body
PF: predicated region fallthrough
CT: control target
= control target key end

     0   :  { %12 = vsyncpa [#allocation5], 0  ;;  %s802_s0 = inlined_call_operand.vmem [shape: bf16[16,128], index: 0, kind: input, shape index: {}]   ;;  %s803_s1 = inlined_call_operand.hbm [shape: bf16[128,128], index: 1, kind: input, shape index: {}]   ;;  %s804_s2 = inlined_call_operand.vmem [shape: f32[1,128], index: 2, kind: input, shape index: {}]   ;;  %s805_s3 = inlined_call_operand.hbm [shape: bf16[128,128], index: 3, kind: input, shape index: {}]   ;;  %s806_s4 = inlined_call_operand.vmem [shape: f32[1,128], index: 4, kind: input, shape index: {}]   ;;  %s807_s5 = inlined_call_operand.hbm [shape: bf16[128,128], index: 5, kind: input, shape index: {}]   ;;  %s808_s6 = inlined_call_operand.vmem [shape: f32[1,128], index: 6, kind: input, shape index: {}]   ;;  %s809_s7 = inlined_call_operand.vmem [shape: f32[16,128], index: 7, kind: output, shape index: {}]  }
   0x1   :  { %13 = vsyncpa [#allocation7], 0  ;;  %s655_s24 = smov [#allocation6]   ;;  %s656_s26 = smov [#allocation4]  }
   0x2   :  { %s35_s25 = sshll.u32 %s655_s24, 4  ;;  %s21_s27 = sshll.u32 %s656_s26, 4  ;;  %s36_s25 = int_to_ptr.vmem [resolvable:$true] %s35_s25  ;;  %s702_s27 = int_to_ptr.vmem [resolvable:$true] %s21_s27 }
   0x3   :  { %s585_s30 = scalar_lea.hbm %s805_s3, 1024 }
   0x4   :  { %p586_p0 = scmp.ne.s32.totalorder %s805_s3, %s585_s30  ;;  %p589_p1 = scmp.lt.u32.totalorder %s585_s30, %s805_s3 }
   0x6   :  { %p591_p2 = pnand %p589_p1, %p586_p0 }
   0x8   :  { %594 = shalt.err (!%p591_p2)
}
   0x9   :  { %s595_s12 = scalar_lea.vmem %s36_s25, 1024  ;;  %p600_p4 = scmp.lt.s32.totalorder %s36_s25, %s36_s25 }
   0xa   :  { %p596_p3 = scmp.ne.s32.totalorder %s36_s25, %s595_s12  ;;  %p601_p5 = scmp.lt.s32.totalorder %s595_s12, %s595_s12 }
   0xc   :  { %p602_p6 = por %p601_p5, %p600_p4 }
   0xe   :  { %p603_p7 = pnand %p602_p6, %p596_p3 }
  0x10   :  { %606 = shalt.err (!%p603_p7)
}
  0x11   :  { %s657_s13 = smov 64   ;;  %s658_s14 = smov 4  }
  0x12   :  { %41 = dma.hbm_to_vmem [thread:$0]  %s805_s3, 1024, %s36_s25, [#allocation7], %s657_s13, %s657_s13, %s658_s14  }
  0x13   :  { %s607_s19 = scalar_lea.hbm %s803_s1, 1024 }
  0x14   :  { %p608_p8 = scmp.ne.s32.totalorder %s803_s1, %s607_s19  ;;  %p611_p9 = scmp.lt.u32.totalorder %s607_s19, %s803_s1 }
  0x16   :  { %p613_p10 = pnand %p611_p9, %p608_p8 }
  0x18   :  { %616 = shalt.err (!%p613_p10)
}
  0x19   :  { %s617_s24 = scalar_lea.vmem %s702_s27, 1024  ;;  %p622_p12 = scmp.lt.s32.totalorder %s702_s27, %s702_s27 }
  0x1a   :  { %p618_p11 = scmp.ne.s32.totalorder %s702_s27, %s617_s24  ;;  %p623_p13 = scmp.lt.s32.totalorder %s617_s24, %s617_s24 }
  0x1c   :  { %p624_p0 = por %p623_p13, %p622_p12 }
  0x1e   :  { %p625_p1 = pnand %p624_p0, %p618_p11 }
  0x20   :  { %628 = shalt.err (!%p625_p1)
}
  0x21   :  { %27 = dma.hbm_to_vmem [thread:$0]  %s803_s1, 1024, %s702_s27, [#allocation5], %s657_s13, %s657_s13, %s658_s14  }
  0x22   :  { %s659_s26 = smov [#allocation8]   ;;  %s629_s8 = scalar_lea.hbm %s807_s5, 1024 }
  0x23   :  { %s49_s28 = sshll.u32 %s659_s26, 4  ;;  %p630_p2 = scmp.ne.s32.totalorder %s807_s5, %s629_s8  ;;  %s50_s28 = int_to_ptr.vmem [resolvable:$true] %s49_s28 }
  0x24   :  { %p633_p3 = scmp.lt.u32.totalorder %s629_s8, %s807_s5 }
  0x26   :  { %p635_p4 = pnand %p633_p3, %p630_p2 }
  0x28   :  { %638 = shalt.err (!%p635_p4)
}
  0x29   :  { %s639_s15 = scalar_lea.vmem %s50_s28, 1024  ;;  %p644_p6 = scmp.lt.s32.totalorder %s50_s28, %s50_s28 }
  0x2a   :  { %p640_p5 = scmp.ne.s32.totalorder %s50_s28, %s639_s15  ;;  %p645_p7 = scmp.lt.s32.totalorder %s639_s15, %s639_s15 }
  0x2c   :  { %p646_p8 = por %p645_p7, %p644_p6 }
  0x2e   :  { %p647_p9 = pnand %p646_p8, %p640_p5 }
  0x30   :  { %650 = shalt.err (!%p647_p9)
}
  0x31   :  { %55 = dma.hbm_to_vmem [thread:$0]  %s807_s5, 1024, %s50_s28, [#allocation7], %s657_s13, %s657_s13, %s658_s14  }
  0x32   :  { %651 = dma.done.wait [#allocation5], 1024  }
  0x33   :  { %652 = vsyncadd [#allocation5], 4294966272 }
  0x34   :  { %653 = dma.done.wait [#allocation7], 2048  }
  0x35   :  { %654 = vsyncadd [#allocation7], 4294965248  ;;  %v660_v0 = vmov 0.0   ;;  %vm661_vm0 = vmmov 0   ;;  %v552_v1 = vld [vmem:[#allocation4] sm:$0xff]   ;;  %v553_v2 = vld [vmem:[#allocation4 + $0x8] sm:$0xff]  }
  0x36   :  { %485 = vmatprep.subr.bf16.mxu0 %v660_v0  ;;  %501 = vmatprep.mubr.msk.bf16.mxu0 %vm661_vm0, %v660_v0  ;;  %v554_v3 = vld [vmem:[#allocation4 + $0x10] sm:$0xff]   ;;  %v561_v4 = vld [vmem:[#allocation6] sm:$0xff]   ;;  %v555_v5 = vld [vmem:[#allocation4 + $0x18] sm:$0xff]  }
  0x37   :  { %505 = vmatprep.subr.bf16.mxu1 %v660_v0  ;;  %521 = vmatprep.mubr.msk.bf16.mxu1 %vm661_vm0, %v660_v0  ;;  %v562_v6 = vld [vmem:[#allocation6 + $0x8] sm:$0xff]   ;;  %v556_v7 = vld [vmem:[#allocation4 + $0x20] sm:$0xff]   ;;  %v563_v8 = vld [vmem:[#allocation6 + $0x10] sm:$0xff]  }
  0x38   :  { %486 = vmatpush3.bf16.msra.mxu0 %v552_v1  ;;  %506 = vmatpush3.bf16.msra.mxu1 %v561_v4  ;;  %v557_v9 = vld [vmem:[#allocation4 + $0x28] sm:$0xff]   ;;  %v564_v10 = vld [vmem:[#allocation6 + $0x18] sm:$0xff]   ;;  %v558_v11 = vld [vmem:[#allocation4 + $0x30] sm:$0xff]  }
  0x39   :  { %487 = vmatprep.subr.bf16.mxu0 %v660_v0  ;;  %507 = vmatprep.subr.bf16.mxu1 %v660_v0  ;;  %v559_v12 = vld [vmem:[#allocation4 + $0x38] sm:$0xff]   ;;  %v560_v13 = vld [vmem:[%s802_s0] sm:$0xff]   ;;  %v566_v15 = vld [vmem:[#allocation6 + $0x28] sm:$0xff]  }
  0x3a   :  { %v565_v14 = vld [vmem:[#allocation6 + $0x20] sm:$0xff]   ;;  %v567_v16 = vld [vmem:[#allocation6 + $0x30] sm:$0xff]   ;;  %v568_v17 = vld [vmem:[#allocation6 + $0x38] sm:$0xff]  }
  0x3b   :  { %v569_v18 = vld [vmem:[#allocation8] sm:$0xff]   ;;  %v570_v19 = vld [vmem:[#allocation8 + $0x8] sm:$0xff]   ;;  %v571_v20 = vld [vmem:[#allocation8 + $0x10] sm:$0xff]  }
  0x3c   :  { %488 = vmatpush3.bf16.msra.mxu0 %v553_v2  ;;  %508 = vmatpush3.bf16.msra.mxu1 %v562_v6  ;;  %v572_v21 = vld [vmem:[#allocation8 + $0x18] sm:$0xff]   ;;  %v430_v22 = vld [vmem:[%s804_s2] ss:$0 sm:$0xff]  ;;  %v574_v33 = vld [vmem:[#allocation8 + $0x28] sm:$0xff]  }
  0x3d   :  { %489 = vmatprep.subr.bf16.mxu0 %v660_v0  ;;  %509 = vmatprep.subr.bf16.mxu1 %v660_v0  ;;  %v573_v32 = vld [vmem:[#allocation8 + $0x20] sm:$0xff]   ;;  %v575_v34 = vld [vmem:[#allocation8 + $0x30] sm:$0xff]   ;;  %v576_v35 = vld [vmem:[#allocation8 + $0x38] sm:$0xff]  }
  0x3e   :  { %v440_v36 = vld [vmem:[%s806_s4] ss:$0 sm:$0xff] }
  0x3f   :  { %v449_v46 = vld [vmem:[%s808_s6] ss:$0 sm:$0xff] }
  0x40   :  { %490 = vmatpush3.bf16.msra.mxu0 %v554_v3  ;;  %510 = vmatpush3.bf16.msra.mxu1 %v563_v8 }
  0x41   :  { %491 = vmatprep.subr.bf16.mxu0 %v660_v0  ;;  %511 = vmatprep.subr.bf16.mxu1 %v660_v0 }
  0x44   :  { %492 = vmatpush3.bf16.msra.mxu0 %v555_v5  ;;  %512 = vmatpush3.bf16.msra.mxu1 %v564_v10 }
  0x45   :  { %493 = vmatprep.subr.bf16.mxu0 %v660_v0  ;;  %513 = vmatprep.subr.bf16.mxu1 %v660_v0 }
  0x48   :  { %494 = vmatpush3.bf16.msra.mxu0 %v556_v7  ;;  %514 = vmatpush3.bf16.msra.mxu1 %v565_v14 }
  0x49   :  { %495 = vmatprep.subr.bf16.mxu0 %v660_v0  ;;  %515 = vmatprep.subr.bf16.mxu1 %v660_v0 }
  0x4c   :  { %496 = vmatpush3.bf16.msra.mxu0 %v557_v9  ;;  %516 = vmatpush3.bf16.msra.mxu1 %v566_v15 }
  0x4d   :  { %497 = vmatprep.subr.bf16.mxu0 %v660_v0  ;;  %517 = vmatprep.subr.bf16.mxu1 %v660_v0 }
  0x50   :  { %498 = vmatpush3.bf16.msra.mxu0 %v558_v11  ;;  %518 = vmatpush3.bf16.msra.mxu1 %v567_v16 }
  0x51   :  { %499 = vmatprep.subr.bf16.mxu0 %v660_v0  ;;  %519 = vmatprep.subr.bf16.mxu1 %v660_v0 }
  0x54   :  { %500 = vmatpush3.bf16.msra.mxu0 %v559_v12  ;;  %520 = vmatpush3.bf16.msra.mxu1 %v568_v17 }
  0x55   :  { %525 = vmatprep.subr.bf16.mxu0 %v660_v0 }
  0x57   :  { %502 = vmatmul.mubr.bf16.vlgmr.msra.gmra.mrb[0].mxu0 %v560_v13 }
  0x58   :  { %541 = vmatprep.mubr.msk.bf16.mxu0 %vm661_vm0, %v660_v0  ;;  %526 = vmatpush3.bf16.msra.mxu0 %v569_v18 }
  0x59   :  { %527 = vmatprep.subr.bf16.mxu0 %v660_v0 }
  0x5c   :  { %528 = vmatpush3.bf16.msra.mxu0 %v570_v19 }
  0x5d   :  { %529 = vmatprep.subr.bf16.mxu0 %v660_v0 }
  0x60   :  { %530 = vmatpush3.bf16.msra.mxu0 %v571_v20 }
  0x61   :  { %531 = vmatprep.subr.bf16.mxu0 %v660_v0 }
  0x64   :  { %532 = vmatpush3.bf16.msra.mxu0 %v572_v21 }
  0x65   :  { %533 = vmatprep.subr.bf16.mxu0 %v660_v0 }
  0x68   :  { %534 = vmatpush3.bf16.msra.mxu0 %v573_v32 }
  0x69   :  { %535 = vmatprep.subr.bf16.mxu0 %v660_v0 }
  0x6c   :  { %536 = vmatpush3.bf16.msra.mxu0 %v574_v33 }
  0x6d   :  { %537 = vmatprep.subr.bf16.mxu0 %v660_v0 }
  0x70   :  { %538 = vmatpush3.bf16.msra.mxu0 %v575_v34 }
  0x71   :  { %539 = vmatprep.subr.bf16.mxu0 %v660_v0 }
  0x74   :  { %540 = vmatpush3.bf16.msra.mxu0 %v576_v35 }
 0x12a   :  { %v181_v23 = vpop.f32.mrb[0].mxu0 }
 0x12b   :  { %v182_v24 = vadd.f32 %v430_v22, %v181_v23  ;;  %v503_v25 = vpop.f32.mrb[1].mxu0 }
 0x12c   :  { %v184_v26 = vpop.f32.mrb[2].mxu0 }
 0x12d   :  { %v185_v27 = vadd.f32 %v430_v22, %v184_v26  ;;  %v504_v28 = vpop.f32.mrb[3].mxu0  ;;  %577 = vtanh.f32 %v182_v24 }
 0x12f   :  { %579 = vtanh.f32 %v185_v27 }
 0x137   :  { %v578_v29 = vpop.eup %577 }
 0x139   :  { %v580_v30 = vpop.eup %579 }
 0x13a   :  { %v190_v31 = vpack.c.bf16 %v580_v30, %v578_v29 }
 0x13c   :  { %522 = vmatmul.mubr.bf16.vlgmr.msra.gmra.mrb[0].mxu1 %v190_v31 }
 0x20f   :  { %v298_v37 = vpop.f32.mrb[0].mxu1 }
 0x210   :  { %v299_v38 = vadd.f32 %v440_v36, %v298_v37  ;;  %v523_v39 = vpop.f32.mrb[1].mxu1 }
 0x211   :  { %v301_v40 = vpop.f32.mrb[2].mxu1 }
 0x212   :  { %v302_v41 = vadd.f32 %v440_v36, %v301_v40  ;;  %v524_v42 = vpop.f32.mrb[3].mxu1  ;;  %581 = vtanh.f32 %v299_v38 }
 0x214   :  { %583 = vtanh.f32 %v302_v41 }
 0x21c   :  { %v582_v43 = vpop.eup %581 }
 0x21e   :  { %v584_v44 = vpop.eup %583 }
 0x21f   :  { %v307_v45 = vpack.c.bf16 %v584_v44, %v582_v43 }
 0x221   :  { %542 = vmatmul.mubr.bf16.vlgmr.msra.gmra.mrb[4].mxu0 %v307_v45 }
 0x2f4   :  { %v415_v47 = vpop.f32.mrb[4].mxu0 }
 0x2f5   :  { %v416_v48 = vadd.f32 %v449_v46, %v415_v47  ;;  %v543_v49 = vpop.f32.mrb[5].mxu0 }
 0x2f6   :  { %v418_v50 = vpop.f32.mrb[6].mxu0 }
 0x2f7   :  { %422 = vst [vmem:[%s809_s7] sm:$0xff] %v416_v48  ;;  %v419_v51 = vadd.f32 %v449_v46, %v418_v50  ;;  %v544_v52 = vpop.f32.mrb[7].mxu0 }
 0x2f9   :  { %423 = vst [vmem:[%s809_s7 + $0x8] sm:$0xff] %v419_v51 }
 0x2fa   :  { %428 = vsyncpa [#allocation5], 1 }
 0x2fb   :  { %429 = vsyncpa [#allocation7], 1 }

</bundles_post_ra>
